<compile_context>
chip_gen: v7x
topology: tpu7x:2x2x1
jax: 0.10.0
libtpu: 0.0.40
codegen_flags: <defaults>
</compile_context>

<pallas_src>
import jax
import jax.numpy as jnp
from jax.experimental import pallas as pl
from jax.experimental.pallas import tpu as pltpu


_LANE_CHOICES = (1024, 512, 256, 128)    # lane-dense last dims (multiples of 128)
_BLOCK_BYTES = 4 * 1024 * 1024           # ~4 MiB/block -> ~16 MiB pipeline footprint
_VMEM_LIMIT_BYTES = 48 * 1024 * 1024     # >> footprint, < v7x 64 MiB physical VMEM


def _relu_aq_kernel(x_ref, o_ref):
    x = x_ref[...]
    # Horner form of x^2/8 + x/2 + 1/4 ; weak-typed consts keep input dtype.
    o_ref[...] = (x * 0.125 + 0.5) * x + 0.25


def _round_up(n, m):
    return (n + m - 1) // m * m


def relu_aq(x):
    """Approximate-quadratic 'ReLU' activation, elementwise (floating dtypes)."""
    assert jnp.issubdtype(x.dtype, jnp.floating), "relu_aq expects a floating dtype"
    orig_shape = x.shape
    dtype = x.dtype
    total = int(x.size)
    if total == 0:
        return x

    itemsize = jnp.dtype(dtype).itemsize

    # Lane-dense view: largest lane width that divides total -> no pad/slice.
    lane = next((l for l in _LANE_CHOICES if total % l == 0), None)
    pad = 0
    if lane is None:
        # Rare fallback: element count not a multiple of 128.
        # TODO(synk): could mask the tail store in-kernel via a scalar-prefetched
        # length instead of paying this extra pad + slice HBM pass.
        lane = 128
        pad = _round_up(total, lane) - total

    flat = x.reshape((-1,))
    if pad:
        flat = jnp.pad(flat, (0, pad))
    rows = (total + pad) // lane
    x2d = flat.reshape((rows, lane))

    # Row tile: dtype-aware sublane granule, ~4 MiB blocks, and >=2 grid steps
    # when possible so v7x's two TensorCores both get work ("parallel" axis).
    granule = max(8, 32 // itemsize)
    tm_max = max(granule, (_BLOCK_BYTES // (lane * itemsize)) // granule * granule)
    tm = min(tm_max, _round_up(pl.cdiv(rows, 2), granule))
    if tm >= rows:
        tm = rows                    # single block == full array dims (always legal)
    grid = (pl.cdiv(rows, tm),)      # last block may be partial; Pallas masks it

    out2d = pl.pallas_call(
        _relu_aq_kernel,
        out_shape=jax.ShapeDtypeStruct((rows, lane), dtype),
        grid=grid,
        in_specs=[pl.BlockSpec((tm, lane), lambda i: (i, 0))],
        out_specs=pl.BlockSpec((tm, lane), lambda i: (i, 0)),
        compiler_params=pltpu.CompilerParams(
            dimension_semantics=("parallel",),
            vmem_limit_bytes=_VMEM_LIMIT_BYTES,
        ),
        cost_estimate=pl.CostEstimate(
            flops=4 * total,
            transcendentals=0,
            bytes_accessed=2 * total * itemsize,
        ),
        # TODO(synk): add input_output_aliases={0: 0} at call sites that can
        # donate x (drops the separate output allocation); not assumed here.
    )(x2d)

    out_flat = out2d.reshape((-1,))
    if pad:
        out_flat = out_flat[:total]
    return out_flat.reshape(orig_shape)


if __name__ == "__main__":
    key = jax.random.PRNGKey(0)
    # Small NCHW input consistent with typical usage of this activation.
    x = jax.random.normal(key, (2, 4, 16, 16), dtype=jnp.float32)

    y = relu_aq(x)
    jax.block_until_ready(y)

    # Reference check in plain JAX (matches the PyTorch forward).
    y_ref = x ** 2 / 8.0 + x / 2.0 + 0.25
    assert y.shape == x.shape
    assert y.dtype == x.dtype
    assert jnp.allclose(y, y_ref, atol=1e-6), "mismatch vs reference"

    print("KERNEL_OK")
</pallas_src>

<mosaic_0001>
module attributes {stable_mosaic.version = 11 : i64} {
  func.func @_relu_aq_kernel(%arg0: i32, %arg1: memref<2x1024xf32, #tpu.memory_space<vmem>>, %arg2: memref<2x1024xf32, #tpu.memory_space<vmem>>) attributes {dimension_semantics = [#tpu.dimension_semantics<parallel>], iteration_bounds = array<i64: 1>, scalar_prefetch = 0 : i64, scratch_operands = 0 : i64, tpu.core_type = #tpu.core_type<tc>, window_params = [{transform_indices = @transform_0, window_bounds = array<i64: 2, 1024>}, {transform_indices = @transform_1, window_bounds = array<i64: 2, 1024>}]} {
    %c0 = arith.constant 0 : index
    %c0_0 = arith.constant 0 : index
    %0 = vector.load %arg1[%c0, %c0_0] : memref<2x1024xf32, #tpu.memory_space<vmem>>, vector<2x1024xf32>
    %cst = arith.constant 1.250000e-01 : f32
    %1 = vector.broadcast %cst : f32 to vector<2x1024xf32>
    %2 = arith.mulf %0, %1 : vector<2x1024xf32>
    %cst_1 = arith.constant 5.000000e-01 : f32
    %3 = vector.broadcast %cst_1 : f32 to vector<2x1024xf32>
    %4 = arith.addf %2, %3 : vector<2x1024xf32>
    %5 = arith.mulf %4, %0 : vector<2x1024xf32>
    %cst_2 = arith.constant 2.500000e-01 : f32
    %6 = vector.broadcast %cst_2 : f32 to vector<2x1024xf32>
    %7 = arith.addf %5, %6 : vector<2x1024xf32>
    %c0_3 = arith.constant 0 : index
    %c0_4 = arith.constant 0 : index
    %8 = vector.load %arg2[%c0_3, %c0_4] : memref<2x1024xf32, #tpu.memory_space<vmem>>, vector<2x1024xf32>
    tpu.vector_store %arg2[%c0_3, %c0_4], %7 {strides = array<i32>} : memref<2x1024xf32, #tpu.memory_space<vmem>>, vector<2x1024xf32>,
    return
  }
  func.func @transform_0(%arg0: i32) -> (i32, i32) {
    %c0_i32 = arith.constant 0 : i32
    %c0_i32_0 = arith.constant 0 : i32
    return %arg0, %c0_i32 : i32, i32
  }
  func.func @transform_1(%arg0: i32) -> (i32, i32) {
    %c0_i32 = arith.constant 0 : i32
    %c0_i32_0 = arith.constant 0 : i32
    return %arg0, %c0_i32 : i32, i32
  }
}

</mosaic_0001>

<bundles_post_ra>
// kernel: tpu_custom_call.1
= control target key start
LH: loop header
LB: loop body
LE: loop exit
PB: predicated region body
PF: predicated region fallthrough
CT: control target
= control target key end

     0   :  { %6 = vsyncpa [#allocation3], 0  ;;  %s134_s0 = inlined_call_operand.hbm [shape: f32[2,1024], index: 0, kind: input, shape index: {}]   ;;  %s135_s1 = inlined_call_operand.hbm [shape: f32[2,1024], index: 1, kind: output, shape index: {}]  }
   0x1   :  { %7 = vsyncpa [#allocation4], 0  ;;  %s98_s6 = smov [#allocation2]   ;;  %s50_s10 = scalar_lea.hbm %s134_s0, 256 }
   0x2   :  { %s14_s7 = sshll.u32 %s98_s6, 4  ;;  %p51_p0 = scmp.ne.s32.totalorder %s134_s0, %s50_s10  ;;  %s15_s7 = int_to_ptr.vmem [resolvable:$true] %s14_s7 }
   0x3   :  { %p54_p1 = scmp.lt.u32.totalorder %s50_s10, %s134_s0 }
   0x5   :  { %p56_p2 = pnand %p54_p1, %p51_p0 }
   0x7   :  { %59 = shalt.err (!%p56_p2)
}
   0x8   :  { %s60_s15 = scalar_lea.vmem %s15_s7, 256  ;;  %p65_p4 = scmp.lt.s32.totalorder %s15_s7, %s15_s7 }
   0x9   :  { %p61_p3 = scmp.ne.s32.totalorder %s15_s7, %s60_s15  ;;  %p66_p5 = scmp.lt.s32.totalorder %s60_s15, %s60_s15 }
   0xb   :  { %p67_p6 = por %p66_p5, %p65_p4 }
   0xd   :  { %p68_p7 = pnand %p67_p6, %p61_p3 }
   0xf   :  { %71 = shalt.err (!%p68_p7)
}
  0x10   :  { %17 = dma.hbm_to_vmem [thread:$0]  %s134_s0, 256, %s15_s7, [#allocation3]  }
  0x11   :  { %94 = dma.done.wait [#allocation3], 256  }
  0x12   :  { %95 = vsyncadd [#allocation3], 4294967040  ;;  %v21_v0 = vld [vmem:[#allocation2] sm:$0xff]  ;;  %v22_v1 = vld [vmem:[#allocation2 + $0x8] sm:$0xff]  ;;  %s99_s18 = smov [#allocation5]  }
  0x13   :  { %v23_v2 = vmul.f32 0.125, %v21_v0  ;;  %v24_v3 = vmul.f32 0.125, %v22_v1  ;;  %s39_s19 = sshll.u32 %s99_s18, 4  ;;  %s40_s19 = int_to_ptr.vmem [resolvable:$true] %s39_s19 }
  0x14   :  { %s72_s20 = scalar_lea.vmem %s40_s19, 256  ;;  %p77_p9 = scmp.lt.s32.totalorder %s40_s19, %s40_s19 }
  0x15   :  { %v25_v4 = vadd.f32 0.5, %v23_v2  ;;  %v26_v5 = vadd.f32 0.5, %v24_v3  ;;  %p73_p8 = scmp.ne.s32.totalorder %s40_s19, %s72_s20  ;;  %p78_p10 = scmp.lt.s32.totalorder %s72_s20, %s72_s20 }
  0x17   :  { %v27_v6 = vmul.f32 %v25_v4, %v21_v0  ;;  %v28_v7 = vmul.f32 %v26_v5, %v22_v1  ;;  %p79_p11 = por %p78_p10, %p77_p9 }
  0x19   :  { %v29_v8 = vadd.f32 0.25, %v27_v6  ;;  %v30_v9 = vadd.f32 0.25, %v28_v7  ;;  %p80_p12 = pnand %p79_p11, %p73_p8 }
  0x1b   :  { %31 = vst [vmem:[#allocation5] sm:$0xff] %v29_v8  ;;  %32 = vst [vmem:[#allocation5 + $0x8] sm:$0xff] %v30_v9 }
  0x1c   :  { %83 = shalt.err (!%p80_p12)
}
  0x1d   :  { %s84_s22 = scalar_lea.hbm %s135_s1, 256 }
  0x1e   :  { %p85_p13 = scmp.ne.s32.totalorder %s135_s1, %s84_s22  ;;  %p88_p0 = scmp.lt.u32.totalorder %s84_s22, %s135_s1 }
  0x20   :  { %p90_p1 = pnand %p88_p0, %p85_p13 }
  0x22   :  { %93 = shalt.err (!%p90_p1)
}
  0x23   :  { %42 = dma.vmem_to_hbm [thread:$0]  %s40_s19, 256, %s135_s1, [#allocation4]  }
  0x24   :  { %96 = dma.done.wait [#allocation4], 256  }
  0x25   :  { %97 = vsyncadd [#allocation4], 4294967040 }
  0x26   :  { %46 = vsyncpa [#allocation3], 1 }
  0x27   :  { %47 = vsyncpa [#allocation4], 1 }

</bundles_post_ra>
